<compile_context>
chip_gen: v6e
topology: v6e:2x2x1
jax: 0.10.0
libtpu: 0.0.40
codegen_flags: <defaults>
</compile_context>

<pallas_src>
import functools

import jax
import jax.numpy as jnp
from jax import lax
from jax.experimental import pallas as pl
from jax.experimental.pallas import tpu as pltpu


# ----------------------------------------------------------------------------
# Fused kernel: per-batch LayerNorm(text) + LayerNorm(layout) + bi-modal attn,
# tiled over query rows. Grid = (batch, query_tiles).
# ----------------------------------------------------------------------------
def _prenorm_biattn_kernel(t_ref, l_ref, gb_ref, wt_ref, wl_ref,
                           ot_ref, ol_ref,
                           q_sc, k_sc, vt_sc, vl_sc, *, eps, d, tq):
    qi = pl.program_id(1)

    # Once per batch: normalize both modalities, project, stash bf16 Q/K/V.
    @pl.when(qi == 0)
    def _project():
        def layernorm(x, g, b):
            x = x.astype(jnp.float32)
            mu = jnp.mean(x, axis=-1, keepdims=True)
            xc = x - mu
            var = jnp.mean(xc * xc, axis=-1, keepdims=True)
            return (xc * lax.rsqrt(var + eps) * g + b).astype(jnp.bfloat16)

        gb = gb_ref[...].astype(jnp.float32)              # (4, D): g_t, b_t, g_l, b_l
        xt = layernorm(t_ref[0], gb[0:1], gb[1:2])        # (S, D) bf16
        xl = layernorm(l_ref[0], gb[2:3], gb[3:4])        # (S, D) bf16

        # One fat bf16 matmul per modality: (S, D) @ (D, 3D) -> (S, 3D), f32 acc.
        # 1/sqrt(D) is already folded into the Q columns of the packed weights.
        proj_t = jnp.dot(xt, wt_ref[...], preferred_element_type=jnp.float32)
        proj_l = jnp.dot(xl, wl_ref[...], preferred_element_type=jnp.float32)

        # Slice & cast to bf16 immediately so the f32 (S,3D) projections are
        # dead before the attention phase (VMEM peak reduction).
        q_sc[:, :d] = proj_t[:, :d].astype(jnp.bfloat16)          # Qt
        q_sc[:, d:] = proj_l[:, :d].astype(jnp.bfloat16)          # Ql
        k_sc[:, :d] = proj_t[:, d:2 * d].astype(jnp.bfloat16)     # Kt
        k_sc[:, d:] = proj_l[:, d:2 * d].astype(jnp.bfloat16)     # Kl
        vt_sc[...] = proj_t[:, 2 * d:].astype(jnp.bfloat16)       # Vt
        vl_sc[...] = proj_l[:, 2 * d:].astype(jnp.bfloat16)       # Vl

    # Per query tile: (tq, 2D) slice of [Qt|Ql].
    q_start = pl.multiple_of(qi * tq, tq)
    q_tile = q_sc[pl.ds(q_start, tq), :]                          # (tq, 2D) bf16

    # Bi-modal scores in one contraction over 2D: Qt@Kt^T + Ql@Kl^T, f32 acc.
    dnums = (((1,), (1,)), ((), ()))
    s = lax.dot_general(q_tile, k_sc[...], dnums,
                        preferred_element_type=jnp.float32)       # (tq, S)

    # Row softmax in f32; denominator reciprocal on the EUP.
    m = jnp.max(s, axis=-1, keepdims=True)
    e = jnp.exp(s - m)
    p = (e * pl.reciprocal(jnp.sum(e, axis=-1, keepdims=True), approx=True)
         ).astype(jnp.bfloat16)

    # Two P@V matmuls write directly into the two lane-dense output tiles.
    ot_ref[0] = jnp.dot(p, vt_sc[...],
                        preferred_element_type=jnp.float32).astype(ot_ref.dtype)
    ol_ref[0] = jnp.dot(p, vl_sc[...],
                        preferred_element_type=jnp.float32).astype(ol_ref.dtype)


# ----------------------------------------------------------------------------
# Parameter packing (done once, outside the hot path).
# ----------------------------------------------------------------------------
def pack_params(g_t, b_t, g_l, b_l, wqt, wkt, wvt, wql, wkl, wvl):
    D = wqt.shape[0]
    scale = 1.0 / (D ** 0.5)
    return {
        # LayerNorm gammas/betas stacked into one lane-dense (4, D) block.
        "ln_gb": jnp.stack([g_t, b_t, g_l, b_l], axis=0).astype(jnp.float32),
        # Per-modality packed QKV weights, 1/sqrt(D) folded into Q columns,
        # stored bf16 (MXU-native operands).
        "w_qkv_t": jnp.concatenate([wqt * scale, wkt, wvt], axis=1).astype(jnp.bfloat16),
        "w_qkv_l": jnp.concatenate([wql * scale, wkl, wvl], axis=1).astype(jnp.bfloat16),
    }


def _vmem_budget_bytes(S, D, tq):
    """Per-step VMEM footprint estimate (bytes), with headroom, capped at 64 MiB."""
    bf, f32 = 2, 4
    inputs = 2 * 2 * S * D * bf                       # text/layout, double-buffered bf16
    weights = 2 * D * 3 * D * bf + 4 * D * f32        # single-buffered QKV + LN params
    scratch = 2 * S * 2 * D * bf + 2 * S * D * bf     # [Qt|Ql], [Kt|Kl], Vt, Vl
    outputs = 2 * 2 * tq * D * f32                    # two outputs, double-buffered
    transients = 2 * S * 3 * D * f32 + tq * S * f32 + 2 * S * D * f32
    est = inputs + weights + scratch + outputs + transients
    return int(min(max(est * 5 // 4 + (4 << 20), 32 << 20), 64 << 20))


# ----------------------------------------------------------------------------
# PreNormAttn forward: fn(norm_t(text), norm_l(layout))
# ----------------------------------------------------------------------------
def pre_norm_attn(text_feat, layout_feat, params, *, eps=1e-12, tq=None):
    B, S, D = text_feat.shape
    if tq is None:
        tq = min(S, 256)
    assert S % tq == 0, "sequence length must be divisible by the query tile"
    n_q = S // tq

    # bf16 at the HBM boundary (halves input DMA + buffers); LN upcasts to f32.
    text_bf = text_feat.astype(jnp.bfloat16)
    layout_bf = layout_feat.astype(jnp.bfloat16)

    x_spec = pl.BlockSpec((1, S, D), lambda b, qi: (b, 0, 0))
    # Grid-constant operands: single-buffered (index_map constant over the grid).
    const_spec = lambda shape: pl.BlockSpec(shape, lambda b, qi: (0, 0),
                                            pipeline_mode=pl.Buffered(1))
    out_spec = pl.BlockSpec((1, tq, D), lambda b, qi: (b, qi, 0))

    kernel = functools.partial(_prenorm_biattn_kernel, eps=eps, d=D, tq=tq)
    out_t, out_l = pl.pallas_call(
        kernel,
        out_shape=(jax.ShapeDtypeStruct((B, S, D), jnp.float32),
                   jax.ShapeDtypeStruct((B, S, D), jnp.float32)),
        grid_spec=pltpu.PrefetchScalarGridSpec(
            num_scalar_prefetch=0,
            grid=(B, n_q),
            in_specs=[x_spec, x_spec,
                      const_spec((4, D)),
                      const_spec((D, 3 * D)),
                      const_spec((D, 3 * D))],
            out_specs=(out_spec, out_spec),
            scratch_shapes=[pltpu.VMEM((S, 2 * D), jnp.bfloat16),   # [Qt | Ql]
                            pltpu.VMEM((S, 2 * D), jnp.bfloat16),   # [Kt | Kl]
                            pltpu.VMEM((S, D), jnp.bfloat16),       # Vt
                            pltpu.VMEM((S, D), jnp.bfloat16)]),     # Vl
        compiler_params=pltpu.CompilerParams(
            dimension_semantics=("parallel", "arbitrary"),
            vmem_limit_bytes=_vmem_budget_bytes(S, D, tq)),
    )(text_bf, layout_bf, params["ln_gb"], params["w_qkv_t"], params["w_qkv_l"])
    return out_t, out_l


# ----------------------------------------------------------------------------
# Pure-JAX reference (same bf16 HBM-boundary / bf16-operand / f32-acc policy).
# ----------------------------------------------------------------------------
def _ref_forward(text, layout, raw_params, eps=1e-12):
    (g_t, b_t, g_l, b_l), (wqt, wkt, wvt), (wql, wkl, wvl) = raw_params

    # Same HBM-boundary policy as the kernel: bf16 inputs, f32 LayerNorm.
    text = text.astype(jnp.bfloat16).astype(jnp.float32)
    layout = layout.astype(jnp.bfloat16).astype(jnp.float32)

    def ln(x, g, b):
        mu = jnp.mean(x, axis=-1, keepdims=True)
        var = jnp.mean((x - mu) ** 2, axis=-1, keepdims=True)
        return (x - mu) / jnp.sqrt(var + eps) * g + b

    bf = lambda x: x.astype(jnp.bfloat16)
    D = text.shape[-1]
    scale = 1.0 / (D ** 0.5)

    nt, nl = ln(text, g_t, b_t), ln(layout, g_l, b_l)
    mm = functools.partial(jnp.einsum, preferred_element_type=jnp.float32)
    qt = mm("bsd,de->bse", bf(nt), bf(wqt)) * scale
    kt = mm("bsd,de->bse", bf(nt), bf(wkt))
    vt = mm("bsd,de->bse", bf(nt), bf(wvt))
    ql = mm("bsd,de->bse", bf(nl), bf(wql)) * scale
    kl = mm("bsd,de->bse", bf(nl), bf(wkl))
    vl = mm("bsd,de->bse", bf(nl), bf(wvl))
    s = (mm("bqd,bkd->bqk", bf(qt), bf(kt))
         + mm("bqd,bkd->bqk", bf(ql), bf(kl)))
    p = jax.nn.softmax(s, axis=-1)
    out_t = mm("bqk,bkd->bqd", bf(p), bf(vt))
    out_l = mm("bqk,bkd->bqd", bf(p), bf(vl))
    return out_t, out_l


if __name__ == "__main__":
    B, S, D = 2, 8, 32
    key = jax.random.PRNGKey(0)
    k_text, k_layout, *k_w = jax.random.split(key, 8)

    text_feat = jax.random.normal(k_text, (B, S, D), dtype=jnp.float32)
    layout_feat = jax.random.normal(k_layout, (B, S, D), dtype=jnp.float32)

    # PyTorch nn.LayerNorm default init: weight=1, bias=0.
    g_t = jnp.ones((D,), jnp.float32)
    b_t = jnp.zeros((D,), jnp.float32)
    g_l = jnp.ones((D,), jnp.float32)
    b_l = jnp.zeros((D,), jnp.float32)
    wqt, wkt, wvt, wql, wkl, wvl = (
        jax.random.normal(k, (D, D), dtype=jnp.float32) * (1.0 / D ** 0.5)
        for k in k_w)

    params = pack_params(g_t, b_t, g_l, b_l, wqt, wkt, wvt, wql, wkl, wvl)

    out_t, out_l = jax.block_until_ready(
        pre_norm_attn(text_feat, layout_feat, params))

    ref_t, ref_l = _ref_forward(
        text_feat, layout_feat,
        ((g_t, b_t, g_l, b_l), (wqt, wkt, wvt), (wql, wkl, wvl)))

    # Tolerance reflects bf16 MXU operands (f32 accumulation) in both paths.
    assert jnp.allclose(out_t, ref_t, atol=1e-2, rtol=1e-2), \
        float(jnp.max(jnp.abs(out_t - ref_t)))
    assert jnp.allclose(out_l, ref_l, atol=1e-2, rtol=1e-2), \
        float(jnp.max(jnp.abs(out_l - ref_l)))

    print("KERNEL_OK")
</pallas_src>

<mosaic_0001>
module attributes {stable_mosaic.version = 11 : i64} {
  func.func @_prenorm_biattn_kernel(%arg0: i32, %arg1: i32, %arg2: memref<1x8x32xbf16, #tpu.memory_space<vmem>>, %arg3: memref<1x8x32xbf16, #tpu.memory_space<vmem>>, %arg4: memref<4x32xf32, #tpu.memory_space<vmem>>, %arg5: memref<32x96xbf16, #tpu.memory_space<vmem>>, %arg6: memref<32x96xbf16, #tpu.memory_space<vmem>>, %arg7: memref<1x8x32xf32, #tpu.memory_space<vmem>>, %arg8: memref<1x8x32xf32, #tpu.memory_space<vmem>>, %arg9: memref<8x64xbf16, #tpu.memory_space<vmem>>, %arg10: memref<8x64xbf16, #tpu.memory_space<vmem>>, %arg11: memref<8x32xbf16, #tpu.memory_space<vmem>>, %arg12: memref<8x32xbf16, #tpu.memory_space<vmem>>) attributes {dimension_semantics = [#tpu.dimension_semantics<parallel>, #tpu.dimension_semantics<arbitrary>], iteration_bounds = array<i64: 2, 1>, scalar_prefetch = 0 : i64, scratch_operands = 4 : i64, tpu.core_type = #tpu.core_type<tc>, window_params = [{transform_indices = @transform_0, window_bounds = array<i64: 1, 8, 32>}, {transform_indices = @transform_1, window_bounds = array<i64: 1, 8, 32>}, {pipeline_mode = #tpu.pipeline_mode<synchronous>, transform_indices = @transform_2, window_bounds = array<i64: 4, 32>}, {pipeline_mode = #tpu.pipeline_mode<synchronous>, transform_indices = @transform_3, window_bounds = array<i64: 32, 96>}, {pipeline_mode = #tpu.pipeline_mode<synchronous>, transform_indices = @transform_4, window_bounds = array<i64: 32, 96>}, {transform_indices = @transform_5, window_bounds = array<i64: 1, 8, 32>}, {transform_indices = @transform_6, window_bounds = array<i64: 1, 8, 32>}]} {
    %c0_i32 = arith.constant 0 : i32
    %0 = arith.cmpi eq, %arg1, %c0_i32 : i32
    %1 = arith.extui %0 : i1 to i32
    %c0_i32_0 = arith.constant 0 : i32
    %2 = arith.cmpi ne, %1, %c0_i32_0 : i32
    scf.if %2 {
      %c0_17 = arith.constant 0 : index
      %c0_18 = arith.constant 0 : index
      %30 = vector.load %arg4[%c0_17, %c0_18] : memref<4x32xf32, #tpu.memory_space<vmem>>, vector<4x32xf32>
      %c0_19 = arith.constant 0 : index
      %c0_20 = arith.constant 0 : index
      %c0_21 = arith.constant 0 : index
      %31 = vector.load %arg2[%c0_19, %c0_20, %c0_21] : memref<1x8x32xbf16, #tpu.memory_space<vmem>>, vector<1x8x32xbf16>
      %32 = vector.shape_cast %31 : vector<1x8x32xbf16> to vector<8x32xbf16>
      %33 = vector.extract_strided_slice %30 {offsets = [0, 0], sizes = [1, 32], strides = [1, 1]} : vector<4x32xf32> to vector<1x32xf32>
      %34 = vector.extract_strided_slice %30 {offsets = [1, 0], sizes = [1, 32], strides = [1, 1]} : vector<4x32xf32> to vector<1x32xf32>
      %35 = arith.extf %32 : vector<8x32xbf16> to vector<8x32xf32>
      %cst_22 = arith.constant dense<0.000000e+00> : vector<8xf32>
      %36 = vector.multi_reduction <add>, %35, %cst_22 [1] : vector<8x32xf32> to vector<8xf32>
      %37 = vector.shape_cast %36 : vector<8xf32> to vector<8x1xf32>
      %cst_23 = arith.constant 3.200000e+01 : f32
      %38 = vector.broadcast %cst_23 : f32 to vector<8x1xf32>
      %39 = arith.divf %37, %38 : vector<8x1xf32>
      %40 = vector.broadcast %39 : vector<8x1xf32> to vector<8x32xf32>
      %41 = arith.subf %35, %40 : vector<8x32xf32>
      %42 = arith.mulf %41, %41 : vector<8x32xf32>
      %cst_24 = arith.constant dense<0.000000e+00> : vector<8xf32>
      %43 = vector.multi_reduction <add>, %42, %cst_24 [1] : vector<8x32xf32> to vector<8xf32>
      %44 = vector.shape_cast %43 : vector<8xf32> to vector<8x1xf32>
      %cst_25 = arith.constant 3.200000e+01 : f32
      %45 = vector.broadcast %cst_25 : f32 to vector<8x1xf32>
      %46 = arith.divf %44, %45 : vector<8x1xf32>
      %cst_26 = arith.constant 9.99999996E-13 : f32
      %47 = vector.broadcast %cst_26 : f32 to vector<8x1xf32>
      %48 = arith.addf %46, %47 : vector<8x1xf32>
      %49 = math.rsqrt %48 : vector<8x1xf32>
      %50 = vector.broadcast %49 : vector<8x1xf32> to vector<8x32xf32>
      %51 = arith.mulf %41, %50 : vector<8x32xf32>
      %52 = vector.broadcast %33 : vector<1x32xf32> to vector<8x32xf32>
      %53 = arith.mulf %51, %52 : vector<8x32xf32>
      %54 = vector.broadcast %34 : vector<1x32xf32> to vector<8x32xf32>
      %55 = arith.addf %53, %54 : vector<8x32xf32>
      %56 = arith.truncf %55 : vector<8x32xf32> to vector<8x32xbf16>
      %c0_27 = arith.constant 0 : index
      %c0_28 = arith.constant 0 : index
      %c0_29 = arith.constant 0 : index
      %57 = vector.load %arg3[%c0_27, %c0_28, %c0_29] : memref<1x8x32xbf16, #tpu.memory_space<vmem>>, vector<1x8x32xbf16>
      %58 = vector.shape_cast %57 : vector<1x8x32xbf16> to vector<8x32xbf16>
      %59 = vector.extract_strided_slice %30 {offsets = [2, 0], sizes = [1, 32], strides = [1, 1]} : vector<4x32xf32> to vector<1x32xf32>
      %60 = vector.extract_strided_slice %30 {offsets = [3, 0], sizes = [1, 32], strides = [1, 1]} : vector<4x32xf32> to vector<1x32xf32>
      %61 = arith.extf %58 : vector<8x32xbf16> to vector<8x32xf32>
      %cst_30 = arith.constant dense<0.000000e+00> : vector<8xf32>
      %62 = vector.multi_reduction <add>, %61, %cst_30 [1] : vector<8x32xf32> to vector<8xf32>
      %63 = vector.shape_cast %62 : vector<8xf32> to vector<8x1xf32>
      %cst_31 = arith.constant 3.200000e+01 : f32
      %64 = vector.broadcast %cst_31 : f32 to vector<8x1xf32>
      %65 = arith.divf %63, %64 : vector<8x1xf32>
      %66 = vector.broadcast %65 : vector<8x1xf32> to vector<8x32xf32>
      %67 = arith.subf %61, %66 : vector<8x32xf32>
      %68 = arith.mulf %67, %67 : vector<8x32xf32>
      %cst_32 = arith.constant dense<0.000000e+00> : vector<8xf32>
      %69 = vector.multi_reduction <add>, %68, %cst_32 [1] : vector<8x32xf32> to vector<8xf32>
      %70 = vector.shape_cast %69 : vector<8xf32> to vector<8x1xf32>
      %cst_33 = arith.constant 3.200000e+01 : f32
      %71 = vector.broadcast %cst_33 : f32 to vector<8x1xf32>
      %72 = arith.divf %70, %71 : vector<8x1xf32>
      %cst_34 = arith.constant 9.99999996E-13 : f32
      %73 = vector.broadcast %cst_34 : f32 to vector<8x1xf32>
      %74 = arith.addf %72, %73 : vector<8x1xf32>
      %75 = math.rsqrt %74 : vector<8x1xf32>
      %76 = vector.broadcast %75 : vector<8x1xf32> to vector<8x32xf32>
      %77 = arith.mulf %67, %76 : vector<8x32xf32>
      %78 = vector.broadcast %59 : vector<1x32xf32> to vector<8x32xf32>
      %79 = arith.mulf %77, %78 : vector<8x32xf32>
      %80 = vector.broadcast %60 : vector<1x32xf32> to vector<8x32xf32>
      %81 = arith.addf %79, %80 : vector<8x32xf32>
      %82 = arith.truncf %81 : vector<8x32xf32> to vector<8x32xbf16>
      %c0_35 = arith.constant 0 : index
      %c0_36 = arith.constant 0 : index
      %83 = vector.load %arg5[%c0_35, %c0_36] : memref<32x96xbf16, #tpu.memory_space<vmem>>, vector<32x96xbf16>
      %cst_37 = arith.constant dense<0.000000e+00> : vector<8x96xf32>
      %84 = tpu.matmul %56, %83, %cst_37 {dimension_numbers = #tpu.dot_dimension_numbers<[1], [0], [0], [1], [0, 0, 1, 1], [], []>} : vector<8x32xbf16>, vector<32x96xbf16>, vector<8x96xf32> -> vector<8x96xf32>
      %c0_38 = arith.constant 0 : index
      %c0_39 = arith.constant 0 : index
      %85 = vector.load %arg6[%c0_38, %c0_39] : memref<32x96xbf16, #tpu.memory_space<vmem>>, vector<32x96xbf16>
      %cst_40 = arith.constant dense<0.000000e+00> : vector<8x96xf32>
      %86 = tpu.matmul %82, %85, %cst_40 {dimension_numbers = #tpu.dot_dimension_numbers<[1], [0], [0], [1], [0, 0, 1, 1], [], []>} : vector<8x32xbf16>, vector<32x96xbf16>, vector<8x96xf32> -> vector<8x96xf32>
      %87 = vector.extract_strided_slice %84 {offsets = [0, 0], sizes = [8, 32], strides = [1, 1]} : vector<8x96xf32> to vector<8x32xf32>
      %88 = arith.truncf %87 : vector<8x32xf32> to vector<8x32xbf16>
      %c0_41 = arith.constant 0 : index
      %c0_42 = arith.constant 0 : index
      %89 = vector.load %arg9[%c0_41, %c0_42] : memref<8x64xbf16, #tpu.memory_space<vmem>>, vector<8x32xbf16>
      tpu.vector_store %arg9[%c0_41, %c0_42], %88 {strides = array<i32>} : memref<8x64xbf16, #tpu.memory_space<vmem>>, vector<8x32xbf16>,
      %90 = vector.extract_strided_slice %86 {offsets = [0, 0], sizes = [8, 32], strides = [1, 1]} : vector<8x96xf32> to vector<8x32xf32>
      %91 = arith.truncf %90 : vector<8x32xf32> to vector<8x32xbf16>
      %c0_43 = arith.constant 0 : index
      %c32 = arith.constant 32 : index
      %92 = vector.load %arg9[%c0_43, %c32] : memref<8x64xbf16, #tpu.memory_space<vmem>>, vector<8x32xbf16>
      tpu.vector_store %arg9[%c0_43, %c32], %91 {strides = array<i32>} : memref<8x64xbf16, #tpu.memory_space<vmem>>, vector<8x32xbf16>,
      %93 = vector.extract_strided_slice %84 {offsets = [0, 32], sizes = [8, 32], strides = [1, 1]} : vector<8x96xf32> to vector<8x32xf32>
      %94 = arith.truncf %93 : vector<8x32xf32> to vector<8x32xbf16>
      %c0_44 = arith.constant 0 : index
      %c0_45 = arith.constant 0 : index
      %95 = vector.load %arg10[%c0_44, %c0_45] : memref<8x64xbf16, #tpu.memory_space<vmem>>, vector<8x32xbf16>
      tpu.vector_store %arg10[%c0_44, %c0_45], %94 {strides = array<i32>} : memref<8x64xbf16, #tpu.memory_space<vmem>>, vector<8x32xbf16>,
      %96 = vector.extract_strided_slice %86 {offsets = [0, 32], sizes = [8, 32], strides = [1, 1]} : vector<8x96xf32> to vector<8x32xf32>
      %97 = arith.truncf %96 : vector<8x32xf32> to vector<8x32xbf16>
      %c0_46 = arith.constant 0 : index
      %c32_47 = arith.constant 32 : index
      %98 = vector.load %arg10[%c0_46, %c32_47] : memref<8x64xbf16, #tpu.memory_space<vmem>>, vector<8x32xbf16>
      tpu.vector_store %arg10[%c0_46, %c32_47], %97 {strides = array<i32>} : memref<8x64xbf16, #tpu.memory_space<vmem>>, vector<8x32xbf16>,
      %99 = vector.extract_strided_slice %84 {offsets = [0, 64], sizes = [8, 32], strides = [1, 1]} : vector<8x96xf32> to vector<8x32xf32>
      %100 = arith.truncf %99 : vector<8x32xf32> to vector<8x32xbf16>
      %c0_48 = arith.constant 0 : index
      %c0_49 = arith.constant 0 : index
      %101 = vector.load %arg11[%c0_48, %c0_49] : memref<8x32xbf16, #tpu.memory_space<vmem>>, vector<8x32xbf16>
      tpu.vector_store %arg11[%c0_48, %c0_49], %100 {strides = array<i32>} : memref<8x32xbf16, #tpu.memory_space<vmem>>, vector<8x32xbf16>,
      %102 = vector.extract_strided_slice %86 {offsets = [0, 64], sizes = [8, 32], strides = [1, 1]} : vector<8x96xf32> to vector<8x32xf32>
      %103 = arith.truncf %102 : vector<8x32xf32> to vector<8x32xbf16>
      %c0_50 = arith.constant 0 : index
      %c0_51 = arith.constant 0 : index
      %104 = vector.load %arg12[%c0_50, %c0_51] : memref<8x32xbf16, #tpu.memory_space<vmem>>, vector<8x32xbf16>
      tpu.vector_store %arg12[%c0_50, %c0_51], %103 {strides = array<i32>} : memref<8x32xbf16, #tpu.memory_space<vmem>>, vector<8x32xbf16>,
    } else {
    }
    %c8_i32 = arith.constant 8 : i32
    %3 = arith.muli %arg1, %c8_i32 : i32
    %4 = tpu.assume_multiple %3, 8 : i32
    %5 = arith.index_cast %4 : i32 to index
    %c0 = arith.constant 0 : index
    %6 = vector.load %arg9[%5, %c0] : memref<8x64xbf16, #tpu.memory_space<vmem>>, vector<8x64xbf16>
    %c0_1 = arith.constant 0 : index
    %c0_2 = arith.constant 0 : index
    %7 = vector.load %arg10[%c0_1, %c0_2] : memref<8x64xbf16, #tpu.memory_space<vmem>>, vector<8x64xbf16>
    %cst = arith.constant dense<0.000000e+00> : vector<8x8xf32>
    %8 = tpu.matmul %6, %7, %cst {dimension_numbers = #tpu.dot_dimension_numbers<[1], [1], [0], [0], [0, 0, 1, 0], [], []>} : vector<8x64xbf16>, vector<8x64xbf16>, vector<8x8xf32> -> vector<8x8xf32>
    %cst_3 = arith.constant dense<0xFF800000> : vector<8xf32>
    %9 = vector.multi_reduction <maximumf>, %8, %cst_3 [1] : vector<8x8xf32> to vector<8xf32>
    %10 = vector.shape_cast %9 : vector<8xf32> to vector<8x1xf32>
    %11 = vector.broadcast %10 : vector<8x1xf32> to vector<8x8xf32>
    %12 = arith.subf %8, %11 : vector<8x8xf32>
    %13 = math.exp %12 : vector<8x8xf32>
    %cst_4 = arith.constant dense<0.000000e+00> : vector<8xf32>
    %14 = vector.multi_reduction <add>, %13, %cst_4 [1] : vector<8x8xf32> to vector<8xf32>
    %15 = vector.shape_cast %14 : vector<8xf32> to vector<8x1xf32>
    %16 = tpu.reciprocal %15 {approx = true} : vector<8x1xf32> -> vector<8x1xf32>
    %17 = vector.broadcast %16 : vector<8x1xf32> to vector<8x8xf32>
    %18 = arith.mulf %13, %17 : vector<8x8xf32>
    %19 = arith.truncf %18 : vector<8x8xf32> to vector<8x8xbf16>
    %c0_5 = arith.constant 0 : index
    %c0_6 = arith.constant 0 : index
    %20 = vector.load %arg11[%c0_5, %c0_6] : memref<8x32xbf16, #tpu.memory_space<vmem>>, vector<8x32xbf16>
    %cst_7 = arith.constant dense<0.000000e+00> : vector<8x32xf32>
    %21 = tpu.matmul %19, %20, %cst_7 {dimension_numbers = #tpu.dot_dimension_numbers<[1], [0], [0], [1], [0, 0, 1, 1], [], []>} : vector<8x8xbf16>, vector<8x32xbf16>, vector<8x32xf32> -> vector<8x32xf32>
    %c0_8 = arith.constant 0 : index
    %c0_9 = arith.constant 0 : index
    %c0_10 = arith.constant 0 : index
    %22 = vector.load %arg7[%c0_8, %c0_9, %c0_10] : memref<1x8x32xf32, #tpu.memory_space<vmem>>, vector<1x8x32xf32>
    %23 = vector.shape_cast %22 : vector<1x8x32xf32> to vector<8x32xf32>
    %24 = vector.shape_cast %21 : vector<8x32xf32> to vector<1x8x32xf32>
    tpu.vector_store %arg7[%c0_8, %c0_9, %c0_10], %24 {strides = array<i32>} : memref<1x8x32xf32, #tpu.memory_space<vmem>>, vector<1x8x32xf32>,
    %c0_11 = arith.constant 0 : index
    %c0_12 = arith.constant 0 : index
    %25 = vector.load %arg12[%c0_11, %c0_12] : memref<8x32xbf16, #tpu.memory_space<vmem>>, vector<8x32xbf16>
    %cst_13 = arith.constant dense<0.000000e+00> : vector<8x32xf32>
    %26 = tpu.matmul %19, %25, %cst_13 {dimension_numbers = #tpu.dot_dimension_numbers<[1], [0], [0], [1], [0, 0, 1, 1], [], []>} : vector<8x8xbf16>, vector<8x32xbf16>, vector<8x32xf32> -> vector<8x32xf32>
    %c0_14 = arith.constant 0 : index
    %c0_15 = arith.constant 0 : index
    %c0_16 = arith.constant 0 : index
    %27 = vector.load %arg8[%c0_14, %c0_15, %c0_16] : memref<1x8x32xf32, #tpu.memory_space<vmem>>, vector<1x8x32xf32>
    %28 = vector.shape_cast %27 : vector<1x8x32xf32> to vector<8x32xf32>
    %29 = vector.shape_cast %26 : vector<8x32xf32> to vector<1x8x32xf32>
    tpu.vector_store %arg8[%c0_14, %c0_15, %c0_16], %29 {strides = array<i32>} : memref<1x8x32xf32, #tpu.memory_space<vmem>>, vector<1x8x32xf32>,
    return
  }
  func.func @transform_0(%arg0: i32, %arg1: i32) -> (i32, i32, i32) {
    %c0_i32 = arith.constant 0 : i32
    %c0_i32_0 = arith.constant 0 : i32
    %c0_i32_1 = arith.constant 0 : i32
    return %arg0, %c0_i32, %c0_i32_0 : i32, i32, i32
  }
  func.func @transform_1(%arg0: i32, %arg1: i32) -> (i32, i32, i32) {
    %c0_i32 = arith.constant 0 : i32
    %c0_i32_0 = arith.constant 0 : i32
    %c0_i32_1 = arith.constant 0 : i32
    return %arg0, %c0_i32, %c0_i32_0 : i32, i32, i32
  }
  func.func @transform_2(%arg0: i32, %arg1: i32) -> (i32, i32) {
    %c0_i32 = arith.constant 0 : i32
    %c0_i32_0 = arith.constant 0 : i32
    %c0_i32_1 = arith.constant 0 : i32
    return %c0_i32, %c0_i32_0 : i32, i32
  }
  func.func @transform_3(%arg0: i32, %arg1: i32) -> (i32, i32) {
    %c0_i32 = arith.constant 0 : i32
    %c0_i32_0 = arith.constant 0 : i32
    %c0_i32_1 = arith.constant 0 : i32
    return %c0_i32, %c0_i32_0 : i32, i32
  }
  func.func @transform_4(%arg0: i32, %arg1: i32) -> (i32, i32) {
    %c0_i32 = arith.constant 0 : i32
    %c0_i32_0 = arith.constant 0 : i32
    %c0_i32_1 = arith.constant 0 : i32
    return %c0_i32, %c0_i32_0 : i32, i32
  }
  func.func @transform_5(%arg0: i32, %arg1: i32) -> (i32, i32, i32) {
    %c0_i32 = arith.constant 0 : i32
    %c0_i32_0 = arith.constant 0 : i32
    return %arg0, %arg1, %c0_i32 : i32, i32, i32
  }
  func.func @transform_6(%arg0: i32, %arg1: i32) -> (i32, i32, i32) {
    %c0_i32 = arith.constant 0 : i32
    %c0_i32_0 = arith.constant 0 : i32
    return %arg0, %arg1, %c0_i32 : i32, i32, i32
  }
}

</mosaic_0001>

<bundles_post_ra>
// kernel: tpu_custom_call.1
= control target key start
LH: loop header
LB: loop body
LE: loop exit
PB: predicated region body
PF: predicated region fallthrough
CT: control target
= control target key end

     0   :  { %s1728_s0 = inlined_call_operand.hbm [shape: bf16[2,8,32], index: 0, kind: input, shape index: {}]   ;;  %s1729_s1 = inlined_call_operand.hbm [shape: bf16[2,8,32], index: 1, kind: input, shape index: {}]   ;;  %s1730_s2 = inlined_call_operand.hbm [shape: f32[4,32], index: 2, kind: input, shape index: {}]   ;;  %s1731_s3 = inlined_call_operand.hbm [shape: bf16[32,96], index: 3, kind: input, shape index: {}]   ;;  %s1732_s4 = inlined_call_operand.hbm [shape: bf16[32,96], index: 4, kind: input, shape index: {}]   ;;  %s1733_s5 = inlined_call_operand.hbm [shape: f32[2,8,32], index: 5, kind: output, shape index: {0}]   ;;  %s1734_s6 = inlined_call_operand.hbm [shape: f32[2,8,32], index: 6, kind: output, shape index: {1}]  }
   0x1   :  { %1738 = sst [smem:[#allocation24_spill]] %s1728_s0 }
   0x2   :  { %1739 = sst [smem:[#allocation25_spill]] %s1730_s2 }
   0x3   :  { %1740 = sst [smem:[#allocation26_spill]] %s1731_s3 }
   0x4   :  { %1741 = sst [smem:[#allocation27_spill]] %s1732_s4 }
   0x5   :  { %12 = vsyncpa [#allocation7], 0 }
   0x6   :  { %14 = vsyncpa [#allocation7 + $0x1], 0 }
   0x7   :  { %15 = vsyncpa [#allocation10], 0 }
   0x8   :  { %17 = vsyncpa [#allocation10 + $0x1], 0 }
   0x9   :  { %18 = vsyncpa [#allocation13], 0 }
   0xa   :  { %19 = vsyncpa [#allocation8], 0 }
   0xb   :  { %21 = vsyncpa [#allocation8 + $0x1], 0 }
   0xc   :  { %22 = vsyncpa [#allocation17], 0 }
   0xd   :  { %24 = vsyncpa [#allocation17 + $0x1], 0  ;;  %s1452_s21 = smov 0   ;;  %s1454_s22 = smov 0  }
   0xe   :  { %s1456_s23 = smov 0   ;;  %s1458_s24 = smov 0  }
   0xf   :  { %s1460_s25 = smov 0   ;;  %s1462_s26 = smov 0  }
  0x10 LB: > { %s1483_s27 = sadd.s32 4294967295, %s1401_s26   ;;  %s940_s28 = sadd.s32 4294967294, %s1401_s26   ;;  %s1401_s26 = sphi %s1462_s26, %s30_s26   ;;  %s1397_s25 = sphi %s1460_s25, %s1765_s25   ;;  %s1393_s24 = sphi %s1458_s24, %s1764_s24   ;;  %s1389_s23 = sphi %s1456_s23, %s1763_s23   ;;  %s1385_s22 = sphi %s1454_s22, %s1762_s22   ;;  %s1381_s21 = sphi %s1452_s21, %s1761_s21  }
  0x11   : > { %p62_p0 = scmp.ne.s32.totalorder %s1385_s22, %s1381_s21  ;;  %p1735_p1 = scmp.eq.s32.totalorder %s1483_s27, 0 }
  0x12   : > { %p183_p3 = scmp.eq.s32.totalorder %s940_s28, 1  ;;  %p941_p5 = scmp.ge.s32.totalorder %s1401_s26, 1 }
  0x13   : > { %p1492_p4 = por %p1735_p1, %p62_p0  ;;  %p218_p7 = scmp.lt.s32.totalorder %s1401_s26, 3 }
  0x14   : > { %p1497_p6 = por %p183_p3, %p62_p0  ;;  %s1403_s8 = smov [#allocation11]  }
  0x15   : > { %s1742_s29 = scalar_select %p1492_p4, 1, 0 }
  0x16   : > { %s1743_s30 = scalar_select %p1497_p6, 1, 0 }
  0x17   : > { %p1502_p8 = pnand %p941_p5, %p218_p7  ;;  %s231_s9 = sshll.u32 %s1403_s8, 4  ;;  %s232_s9 = int_to_ptr.vmem [resolvable:$true] %s231_s9 }
  0x18   : > { %s1404_s10 = smov [#allocation12]   ;;  %s1405_s13 = smov [#allocation14]  }
  0x19   : > { %s1744_s7 = scalar_select %p1502_p8, 1, 0 }
  0x1a   : > { %p1043_p10 = pneg %p1502_p8  ;;  %s241_s11 = sshll.u32 %s1404_s10, 4  ;;  %s242_s11 = int_to_ptr.vmem [resolvable:$true] %s241_s11 }
  0x1b   : > { %s254_s14 = sshll.u32 %s1405_s13, 4  ;;  %s1156_s15 = scalar_lea.vmem %s232_s9, 64  ;;  %s255_s14 = int_to_ptr.vmem [resolvable:$true] %s254_s14 }
  0x1c   : > { %p1511_p11 = pnand %p1043_p10, %p1735_p1  ;;  %p1157_p13 = scmp.ne.s32.totalorder %s232_s9, %s1156_s15 }
  0x1d   : > { %p1164_p5 = scmp.lt.s32.totalorder %s232_s9, %s232_s9  ;;  %p1165_p7 = scmp.lt.s32.totalorder %s1156_s15, %s1156_s15 }
  0x1e   : > { %p1147_p12 = pneg %p1511_p11 }
  0x1f   : > { %p1166_p9 = por %p1165_p7, %p1164_p5 }
  0x20   : > { %p1159_p0 = pnand %p1157_p13, %p1147_p12 }
  0x22   : > { %p1160_p3 = pneg %p1159_p0 }
  0x24   : > { %p1167_p10 = pnand %p1166_p9, %p1160_p3 }
  0x26   : > { %1170 = shalt.err (!%p1167_p10)
}
  0x27   : > { %s1746_s2 = sld [smem:[#allocation25_spill]]  ;;  %s1182_s18 = scalar_lea.vmem %s242_s11, 256 }
  0x28   : > { %p1183_p1 = scmp.ne.s32.totalorder %s242_s11, %s1182_s18  ;;  %p1190_p13 = scmp.lt.s32.totalorder %s242_s11, %s242_s11 }
  0x29   : > { %p1191_p0 = scmp.lt.s32.totalorder %s1182_s18, %s1182_s18 }
  0x2a   : > { %p1185_p2 = pnand %p1183_p1, %p1147_p12 }
  0x2b   : > { %p1192_p4 = por %p1191_p0, %p1190_p13 }
  0x2c   : > { %p1186_p6 = pneg %p1185_p2 }
  0x2d   : > { %1046 = dma.hbm_to_vmem [thread:$0]  (!%p1511_p11), %s1746_s2, 64, %s232_s9, [#allocation10]  }
  0x2e   : > { %p1193_p8 = pnand %p1192_p4, %p1186_p6 }
  0x30   : > { %1196 = shalt.err (!%p1193_p8)
}
  0x31   : > { %s1406_s19 = smov 64   ;;  %s1407_s20 = smov 4  }
  0x32   : > { %s1747_s3 = sld [smem:[#allocation26_spill]]  ;;  %s1208_s9 = scalar_lea.vmem %s255_s14, 256 }
  0x33   : > { %p1209_p9 = scmp.ne.s32.totalorder %s255_s14, %s1208_s9  ;;  %p1216_p3 = scmp.lt.s32.totalorder %s255_s14, %s255_s14 }
  0x34   : > { %p1217_p5 = scmp.lt.s32.totalorder %s1208_s9, %s1208_s9 }
  0x35   : > { %p1211_p1 = pnand %p1209_p9, %p1147_p12 }
  0x36   : > { %p1218_p4 = por %p1217_p5, %p1216_p3 }
  0x37   : > { %p1212_p2 = pneg %p1211_p1 }
  0x38   : > { %1049 = dma.hbm_to_vmem [thread:$0]  (!%p1511_p11), %s1747_s3, 256, %s242_s11, [#allocation13], %s1406_s19, %s1406_s19, %s1407_s20  }
  0x39   : > { %p1219_p6 = pnand %p1218_p4, %p1212_p2 }
  0x3b   : > { %1222 = shalt.err (!%p1219_p6)
}
  0x3c   : > { %s1748_s4 = sld [smem:[#allocation27_spill]]  ;;  %s49_s11 = sadd.s32 1, %s1389_s23 }
  0x3d   : > { %s42_s15 = sadd.s32 1, %s1397_s25  ;;  %p56_p8 = scmp.ne.s32.totalorder %s1389_s23, %s1385_s22 }
  0x3e   : > { %p44_p12 = scmp.ge.s32.totalorder %s42_s15, 2  ;;  %p57_p7 = scmp.eq.s32.totalorder %s1401_s26, 0 }
  0x3f   : > { %p1749_p10 = scmp.eq.s32.totalorder %s1483_s27, 1  ;;  %p1070_p0 = scmp.lt.s32.totalorder %s1401_s26, 2 }
  0x40   : > { %s1767_s15 = smov (%p44_p12, %s42_s15), 0  ;;  %p58_p9 = por %p57_p7, %p56_p8 }
  0x41   : > { %p1548_p13 = por %p1749_p10, %p56_p8  ;;  %s268_s16 = sand.u32 1, %s1389_s23  }
  0x42   : > { %1052 = dma.hbm_to_vmem [thread:$0]  (!%p1511_p11), %s1748_s4, 256, %s255_s14, [#allocation13], %s1406_s19, %s1406_s19, %s1407_s20  }
  0x43   : > { %s46_s17 = ssub.s32 %s1397_s25, %s1767_s15  ;;  %s946_s14 = sshll.u32 %s268_s16, 2 }
  0x44   : > { %p47_p11 = scmp.eq.s32.totalorder %s46_s17, 0  ;;  %s947_s18 = sshll.u32 %s1397_s25, 6 }
  0x45   : > { %s1751_s0 = sld [smem:[#allocation24_spill]]  ;;  %s272_s9 = scalar_lea.vmem [#allocation6], %s946_s14 }
  0x46   : > { %s1560_s19 = scalar_select %p47_p11, %s1389_s23, %s49_s11  }
  0x47   : > { %s279_s10 = sshll.u32 %s272_s9, 4  ;;  %p1567_p1 = pnand %p1070_p0, %p58_p9  ;;  %s280_s10 = int_to_ptr.vmem [resolvable:$true] %s279_s10 }
  0x48   : > { %s1574_s17 = scalar_lea.hbm %s1729_s1, %s947_s18  ;;  %s286_s11 = sand.u32 1, %s1401_s26  }
  0x49   : > { %s269_s4 = scalar_lea.sflag [#allocation7], %s268_s16  ;;  %p1225_p2 = pneg %p1567_p1 }
  0x4a   : > { %s1236_s20 = scalar_lea.vmem %s280_s10, 64  ;;  %s1408_s28 = smov [#allocation6]  }
  0x4b   : > { %s277_s8 = scalar_lea.hbm %s1751_s0, %s947_s18  ;;  %p1237_p3 = scmp.ne.s32.totalorder %s280_s10, %s1236_s20 }
  0x4c   : > { %s1241_s9 = sshll.u32 %s1408_s28, 4  ;;  %s1242_s9 = int_to_ptr.vmem [resolvable:$false] %s1241_s9 }
  0x4d   : > { %p1239_p5 = pnand %p1237_p3, %p1225_p2  ;;  %s1243_s0 = scalar_lea.vmem %s1242_s9, 128 }
  0x4e   : > { %p1244_p6 = scmp.lt.s32.totalorder %s280_s10, %s1242_s9  ;;  %p1245_p8 = scmp.lt.s32.totalorder %s1243_s0, %s1236_s20 }
  0x4f   : > { %p1240_p4 = pneg %p1239_p5 }
  0x50   : > { %p1246_p12 = por %p1245_p8, %p1244_p6 }
  0x52   : > { %p1247_p7 = pnand %p1246_p12, %p1240_p4 }
  0x54   : > { %1250 = shalt.err (!%p1247_p7)
}
  0x55   : > { %1056 = dma.hbm_to_vmem [thread:$0]  (!%p1567_p1), %s277_s8, 64, %s280_s10, %s269_s4  }
  0x56   : > { %s290_s2 = scalar_lea.vmem [#allocation9], %s946_s14  ;;  %s287_s16 = scalar_lea.sflag [#allocation10], %s286_s11 }
  0x57   : > { %s297_s3 = sshll.u32 %s290_s2, 4  ;;  %s1409_s28 = smov [#allocation9]   ;;  %s298_s3 = int_to_ptr.vmem [resolvable:$true] %s297_s3 }
  0x58   : > { %s1264_s18 = scalar_lea.vmem %s298_s3, 64  ;;  %s1269_s9 = sshll.u32 %s1409_s28, 4  ;;  %s1270_s9 = int_to_ptr.vmem [resolvable:$false] %s1269_s9 }
  0x59   : > { %p1265_p10 = scmp.ne.s32.totalorder %s298_s3, %s1264_s18  ;;  %s1271_s0 = scalar_lea.vmem %s1270_s9, 128 }
  0x5a   : > { %p1272_p11 = scmp.lt.s32.totalorder %s298_s3, %s1270_s9  ;;  %p1273_p3 = scmp.lt.s32.totalorder %s1271_s0, %s1264_s18 }
  0x5b   : > { %p1267_p0 = pnand %p1265_p10, %p1225_p2 }
  0x5c   : > { %p1274_p5 = por %p1273_p3, %p1272_p11 }
  0x5d   : > { %p1268_p9 = pneg %p1267_p0 }
  0x5f   : > { %p1275_p4 = pnand %p1274_p5, %p1268_p9 }
  0x61   : > { %1278 = shalt.err (!%p1275_p4)
}
  0x62   : > { %1059 = dma.hbm_to_vmem [thread:$0]  (!%p1567_p1), %s1574_s17, 64, %s298_s3, %s287_s16  }
  0x63   : > { %p1753_p6 = scmp.ne.s32.totalorder %s1744_s7, 0 }
  0x64   : > { %s1593_s4 = sand.u32 (!%p1753_p6), 1, %s1385_s22   ;;  %p1754_p2 = scmp.ne.s32.totalorder (!%p1753_p6), %s1742_s29, 0 }
  0x65   : > { %306 = sbr.rel (%p1753_p6) target bundleno = 1494 (0x5d6), region = 40  ;;  %s951_s14 = sshll.u32 (!%p1753_p6), %s1593_s4, 2 }
  0x66   : > { %s309_s8 = scalar_lea.sflag (!%p1753_p6), [#allocation7], %s1593_s4  ;;  %s312_s10 = scalar_lea.vmem (!%p1753_p6), [#allocation6], %s951_s14 }
  0x6a   : > { %1356 = dma.done.wait (%p1754_p2), %s309_s8, 64  }
  0x6b   : > { %1358 = vsyncadd (%p1754_p2), %s309_s8, 4294967232  ;;  %s317_s13 = sand.u32 1, %s1483_s27   ;;  %s321_s7 = scalar_lea.vmem [#allocation9], %s951_s14 }
  0x6c   : > { %s318_s17 = scalar_lea.sflag [#allocation10], %s317_s13 }
  0x6d   : > { %1360 = dma.done.wait (%p1754_p2), %s318_s17, 64  }
  0x6e   : > { %1362 = vsyncadd (%p1754_p2), %s318_s17, 4294967232  ;;  %p1755_p1 = scmp.eq.s32.totalorder %s1483_s27, 0 }
  0x70   : > { %1364 = dma.done.wait (%p1755_p1), [#allocation10], 64   ;;  %p1756_p8 = pmov %p1755_p1 }
  0x71   : > { %p1757_p12 = pmov %p1755_p1 }
  0x72   : > { %1366 = vsyncadd (%p1756_p8), [#allocation10], 4294967232 }
  0x73   : > { %1368 = dma.done.wait (%p1757_p12), [#allocation13], 512   ;;  %p1758_p7 = pmov %p1755_p1 }
  0x74   : > { %vm380_vm0 = vcmask 261120   ;;  %v378_v0 = vld [vmem:[%s312_s10] sm:$0xf]  ;;  %v406_v1 = vld [vmem:[%s321_s7] sm:$0xf]  ;;  %v1410_v18 = vmov 0.0   ;;  %v395_v26 = vlaneseq }
  0x75   : > { %1370 = vsyncadd (%p1758_p7), [#allocation13], 4294966784  ;;  %v379_v2 = vunpack.c.l.bf16 %v378_v0  ;;  %v407_v3 = vunpack.c.l.bf16 %v406_v1  ;;  %v1133_v16 = vld [vmem:[#allocation12 + $0x8] sm:$0xff]   ;;  %v1135_v17 = vld [vmem:[#allocation14 + $0x8] sm:$0xff]   ;;  %989 = vmatprep.subr.bf16.mxu0 %v1410_v18  ;;  %997 = vmatprep.subr.bf16.mxu1 %v1410_v18  ;;  %vm1411_vm1 = vmmov 0   ;;  %vm551_vm2 = vcmask 257024  }
  0x76   : > { %990 = vmatpush3.bf16.msra.mxu0 %v1133_v16  ;;  %v1134_v19 = vld [vmem:[#allocation12] sm:$0xff]   ;;  %998 = vmatpush3.bf16.msra.mxu1 %v1135_v17  ;;  %v1136_v20 = vld [vmem:[#allocation14] sm:$0xff]   ;;  %v396_v28 = vshrl.u32 %v395_v26, 7  ;;  %v377_v30 = vld [vmem:[#allocation11] sm:$0xf]  ;;  %s1412_s27 = smov 96  }
  0x77   : > { %v381_v4 = vsel %vm380_vm0, %v379_v2, 0.0  ;;  %v408_v5 = vsel %vm380_vm0, %v407_v3, 0.0  ;;  %991 = vmatprep.subr.bf16.mxu0 %v1410_v18  ;;  %993 = vmatprep.mubr.msk.bf16.mxu0 %vm1411_vm1, %v1410_v18  ;;  %s1413_s29 = smov 32   ;;  %vm560_vm3 = vcmask 519424   ;;  %vm585_vm4 = vcmask 523264   ;;  %s1414_s11 = smov 64  }
  0x78   : > { %382 = vadd.xlane.f32.xlu0 %v381_v4  ;;  %999 = vmatprep.subr.bf16.mxu1 %v1410_v18  ;;  %v397_v29 = vsub.s32 0, %v396_v28  ;;  %v402_v31 = vsub.s32 1, %v396_v28  ;;  %v423_v33 = vsub.s32 2, %v396_v28  ;;  %v428_v37 = vsub.s32 3, %v396_v28  ;;  %s956_s20 = sshll.u32 %s1593_s4, 3  ;;  %s971_s2 = sshll.u32 %s1393_s24, 7 }
  0x79   : > { %1001 = vmatprep.mubr.msk.bf16.mxu1 %vm1411_vm1, %v1410_v18  ;;  %vm632_vm5 = vcmask 64512   ;;  %vm649_vm6 = vcmask 1043456   ;;  %s364_s3 = scalar_lea.vmem [#allocation15], %s956_s20  ;;  %s371_s18 = scalar_lea.vmem [#allocation16], %s956_s20 }
  0x7a   : > { %992 = vmatpush3.bf16.msra.mxu0 %v1134_v19  ;;  %1000 = vmatpush3.bf16.msra.mxu1 %v1136_v20  ;;  %v398_v32 = vrot.slane %v377_v30, %v397_v29  ;;  %v403_v36 = vrot.slane %v377_v30, %v402_v31  ;;  %v424_v39 = vrot.slane %v377_v30, %v423_v33  ;;  %s760_s16 = sshll.u32 %s364_s3, 4  ;;  %s774_s28 = sshll.u32 %s371_s18, 4  ;;  %s1652_s16 = int_to_ptr.vmem [resolvable:$true] %s760_s16  ;;  %s1659_s28 = int_to_ptr.vmem [resolvable:$true] %s774_s28 }
  0x7b   : > { %1005 = vmatprep.subr.bf16.mxu0 %v1410_v18  ;;  %1011 = vmatprep.subr.bf16.mxu1 %v1410_v18  ;;  %v429_v43 = vrot.slane %v377_v30, %v428_v37  ;;  %s1650_s14 = scalar_lea.hbm %s1733_s5, %s971_s2  ;;  %s1657_s24 = scalar_lea.hbm %s1734_s6, %s971_s2 }
  0x7c   : > { %409 = vadd.xlane.f32.xlu0 %v408_v5  ;;  %s741_s13 = scalar_lea.sflag [#allocation8], %s1593_s4  ;;  %s1279_s17 = scalar_lea.vmem %s1652_s16, 128 }
  0x7d   : > { %p1280_p10 = scmp.ne.s32.totalorder %s1652_s16, %s1279_s17  ;;  %s1415_s7 = smov [#allocation15]  }
  0x7f   : > { %p1281_p0 = pnand %p1280_p10, %p1548_p13 }
  0x81   : > { %p1282_p9 = pneg %p1281_p0 }
 0x101   : > { %v383_v6 = vpop.xlane.xlu0 %382 }
 0x102   : > { %v385_v7 = vmul.f32 0.03125, %v383_v6 }
 0x104   : > { %v386_v8 = vsub.f32 %v379_v2, %v385_v7 }
 0x105   : > { %v410_v9 = vpop.xlane.xlu0 %409 }
 0x106   : > { %v411_v10 = vmul.f32 0.03125, %v410_v9  ;;  %v387_v11 = vmul.f32 %v386_v8, %v386_v8 }
 0x108   : > { %v412_v12 = vsub.f32 %v407_v3, %v411_v10  ;;  %v388_v13 = vsel %vm380_vm0, %v387_v11, 0.0 }
 0x109   : > { %389 = vadd.xlane.f32.xlu1 %v388_v13 }
 0x10a   : > { %v413_v14 = vmul.f32 %v412_v12, %v412_v12 }
 0x10c   : > { %v414_v15 = vsel %vm380_vm0, %v413_v14, 0.0 }
 0x10d   : > { %415 = vadd.xlane.f32.xlu1 %v414_v15 }
 0x192   : > { %v390_v21 = vpop.xlane.xlu1 %389 }
 0x193   : > { %v391_v22 = vmul.f32 0.03125, %v390_v21 }
 0x195   : > { %v392_v23 = vadd.f32 1e-12, %v391_v22 }
 0x196   : > { %v416_v24 = vpop.xlane.xlu1 %415 }
 0x197   : > { %1137 = vrsqrt.f32 %v392_v23  ;;  %v417_v25 = vmul.f32 0.03125, %v416_v24 }
 0x199   : > { %v418_v27 = vadd.f32 1e-12, %v417_v25 }
 0x19b   : > { %1139 = vrsqrt.f32 %v418_v27 }
 0x1a4   : > { %v1138_v34 = vpop.eup %1137 }
 0x1a5   : > { %v394_v35 = vmul.f32 %v1138_v34, %v386_v8 }
 0x1a7   : > { %v399_v38 = vmul.f32 %v398_v32, %v394_v35 }
 0x1a8   : > { %v1140_v40 = vpop.eup %1139 }
 0x1a9   : > { %v404_v41 = vadd.f32 %v403_v36, %v399_v38  ;;  %v420_v42 = vmul.f32 %v1140_v40, %v412_v12 }
 0x1ab   : > { %v405_v44 = vpack.c.bf16 %v404_v41, %v404_v41  ;;  %v425_v45 = vmul.f32 %v424_v39, %v420_v42 }
 0x1ad   : > { %994 = vmatmul.mubr.msk.bf16.vlgmr.msra.gmra.mxu0 %vm380_vm0, %v405_v44  ;;  %v430_v46 = vadd.f32 %v429_v43, %v425_v45 }
 0x1ae   : > { %1007 = vmatprep.mubr.msk.bf16.mxu0 %vm1411_vm1, %v1410_v18 }
 0x1af   : > { %v431_v47 = vpack.c.bf16 %v430_v46, %v430_v46 }
 0x1b1   : > { %1002 = vmatmul.mubr.msk.bf16.vlgmr.msra.gmra.mxu1 %vm380_vm0, %v431_v47 }
 0x1b2   : > { %1013 = vmatprep.mubr.msk.bf16.mxu1 %vm1411_vm1, %v1410_v18 }
 0x26d   : > { %v485_v48 = vpop.f32.mrf.mxu0 }
 0x26e   : > { %v550_v49 = vpack.c.bf16 %v485_v48, %v485_v48 }
 0x26f   : > { %v995_v50 = vpop.f32.mrf.mxu0 }
 0x270   : > { %552 = vst.msk [vmem:[#allocation2] sm:$0xf] %vm551_vm2, %v550_v49  ;;  %565 = vrot.lane.b32.xlu0 %v550_v49, %s1412_s27  ;;  %s1283_s27 = sshll.u32 %s1415_s7, 4  ;;  %s1284_s27 = int_to_ptr.vmem [resolvable:$false] %s1283_s27 }
 0x271   : > { %v488_v51 = vpop.f32.mrf.mxu0  ;;  %v544_v52 = vpop.f32.mrf.mxu1  ;;  %p1286_p11 = scmp.lt.s32.totalorder %s1652_s16, %s1284_s27 }
 0x272   : > { %v553_v53 = vpack.c.bf16 %v544_v52, %v544_v52 }
 0x273   : > { %v996_v54 = vpop.f32.mrf.mxu0  ;;  %v1003_v55 = vpop.f32.mrf.mxu1 }
 0x274   : > { %557 = vrot.lane.b32.xlu1 %v553_v53, %s1413_s29  ;;  %s1285_s29 = scalar_lea.vmem %s1284_s27, 256 }
 0x275   : > { %v547_v56 = vpop.f32.mrf.mxu1  ;;  %p1287_p3 = scmp.lt.s32.totalorder %s1285_s29, %s1279_s17 }
 0x277   : > { %v1004_v57 = vpop.f32.mrf.mxu1  ;;  %p1288_p5 = por %p1287_p3, %p1286_p11 }
 0x279   : > { %p1289_p4 = pnand %p1288_p5, %p1282_p9 }
 0x2e2   : > { %v566_v58 = vpop.permute.xlu0 %565 }
 0x2e3   : > { %568 = vst.msk [vmem:[#allocation3] sm:$0xf] %vm551_vm2, %v566_v58 }
 0x2e4   : > { %569 = vst.msk [vmem:[#allocation3] sm:$0xf] %vm560_vm3, %v553_v53 }
 0x2e6   : > { %v558_v59 = vpop.permute.xlu1 %557 }
 0x2e7   : > { %561 = vst.msk [vmem:[#allocation2] sm:$0xf] %vm560_vm3, %v558_v59 }
 0x2eb   : > { %v584_v60 = vld [vmem:[#allocation3] sm:$0xf] }
 0x2ec   : > { %v590_v61 = vsel %vm585_vm4, %v584_v60, 0 }
 0x2ed   : > { %1006 = vmatpush3.bf16.xpose.msra.mxu0 %v590_v61 }
 0x2ee   : > { %1017 = vmatprep.subr.bf16.mxu0 %v1410_v18  ;;  %v583_v62 = vld [vmem:[#allocation2] sm:$0xf] }
 0x2f4   : > { %1008 = vmatmul.mubr.msk.bf16.vlgmr.msra.gmra.mxu0 %vm585_vm4, %v583_v62 }
 0x2f5   : > { %1019 = vmatprep.mubr.msk.bf16.mxu0 %vm1411_vm1, %v1410_v18 }
 0x3b4   : > { %v626_v63 = vpop.f32.mrf.mxu0 }
 0x3b5   : > { %v633_v0 = vsel %vm632_vm5, %v626_v63, -inf }
 0x3b6   : > { %634 = vmax.xlane.f32.xlu1 %v633_v0  ;;  %v1009_v1 = vpop.f32.mrf.mxu0 }
 0x3b8   : > { %v629_v2 = vpop.f32.mrf.mxu0 }
 0x3ba   : > { %v1010_v3 = vpop.f32.mrf.mxu0 }
 0x3c7   : > { %574 = vrot.lane.b32.xlu1 %v553_v53, %s1414_s11 }
 0x43f   : > { %v635_v4 = vpop.xlane.xlu1 %634 }
 0x440   : > { %v636_v5 = vsub.f32 %v626_v63, %v635_v4 }
 0x442   : > { %v637_v6 = vmul.f32 1.442695, %v636_v5 }
 0x443   : > { %v575_v7 = vpop.permute.xlu1 %574 }
 0x444   : > { %1141 = vpow2.f32 %v637_v6  ;;  %577 = vst.msk [vmem:[#allocation5] sm:$0xf] %vm551_vm2, %v575_v7 }
 0x44b   : > { %v695_v8 = vld [vmem:[#allocation5] sm:$0xf] }
 0x44c   : > { %v697_v9 = vsel %vm649_vm6, %v695_v8, 0 }
 0x44d   : > { %1018 = vmatpush3.bf16.msra.mxu0 %v697_v9 }
 0x451   : > { %v1142_v10 = vpop.eup %1141 }
 0x452   : > { %v639_v11 = vsel %vm632_vm5, %v1142_v10, 0.0 }
 0x453   : > { %640 = vadd.xlane.f32.xlu0 %v639_v11 }
 0x469   : > { %570 = vrot.lane.b32.xlu0 %v550_v49, %s1414_s11 }
 0x4dc   : > { %v641_v12 = vpop.xlane.xlu0 %640 }
 0x4dd   : > { %1143 = vrcp.f32 %v641_v12 }
 0x4e0   : > { %v571_v13 = vpop.permute.xlu0 %570 }
 0x4e1   : > { %573 = vst.msk [vmem:[#allocation4] sm:$0xf] %vm551_vm2, %v571_v13 }
 0x4e8   : > { %v645_v14 = vld [vmem:[#allocation4] sm:$0xf] }
 0x4e9   : > { %v651_v15 = vsel %vm649_vm6, %v645_v14, 0 }
 0x4ea   : > { %v1144_v16 = vpop.eup %1143  ;;  %1012 = vmatpush3.bf16.msra.mxu1 %v651_v15 }
 0x4eb   : > { %v643_v17 = vmul.f32 %v1144_v16, %v1142_v10 }
 0x4ed   : > { %v644_v18 = vpack.c.bf16 %v643_v17, %v643_v17 }
 0x4ef   : > { %1014 = vmatmul.mubr.msk.bf16.vlgmr.msra.gmra.mxu1 %vm632_vm5, %v644_v18  ;;  %1020 = vmatmul.mubr.msk.bf16.vlgmr.msra.gmra.mxu0 %vm632_vm5, %v644_v18 }
 0x5af   : > { %v687_v19 = vpop.f32.mrf.mxu1  ;;  %v733_v20 = vpop.f32.mrf.mxu0 }
 0x5b0   : > { %694 = vst.msk [vmem:[%s364_s3] sm:$0xff] %vm380_vm0, %v687_v19  ;;  %739 = vst.msk [vmem:[%s371_s18] sm:$0xff] %vm380_vm0, %v733_v20 }
 0x5b1   : > { %v1015_v21 = vpop.f32.mrf.mxu1  ;;  %v1021_v22 = vpop.f32.mrf.mxu0 }
 0x5b2   : > { %1292 = shalt.err (!%p1289_p4)
}
 0x5b3   : > { %s1293_s11 = scalar_lea.hbm %s1650_s14, 128  ;;  %s1297_s3 = scalar_lea.hbm %s1733_s5, 256 }
 0x5b4   : > { %p1294_p6 = scmp.ne.s32.totalorder %s1650_s14, %s1293_s11  ;;  %p1298_p8 = scmp.lt.s32.totalorder %s1650_s14, %s1733_s5 }
 0x5b5   : > { %p1299_p12 = scmp.lt.s32.totalorder %s1297_s3, %s1293_s11 }
 0x5b6   : > { %p1295_p2 = pnand %p1294_p6, %p1548_p13 }
 0x5b7   : > { %p1300_p7 = por %p1299_p12, %p1298_p8 }
 0x5b8   : > { %p1296_p1 = pneg %p1295_p2 }
 0x5ba   : > { %p1301_p10 = pnand %p1300_p7, %p1296_p1 }
 0x5bc   : > { %1304 = shalt.err (!%p1301_p10)
}
 0x5bd   : > { %1039 = dma.vmem_to_hbm [thread:$0]  (%p1548_p13), %s1652_s16, 128, %s1650_s14, %s741_s13  }
 0x5be   : > { %s746_s0 = scalar_lea.sflag [#allocation17], %s1593_s4  ;;  %s1305_s8 = scalar_lea.vmem %s1659_s28, 128 }
 0x5bf   : > { %p1306_p0 = scmp.ne.s32.totalorder %s1659_s28, %s1305_s8  ;;  %s1416_s10 = smov [#allocation16]  }
 0x5c0   : > { %s1309_s17 = sshll.u32 %s1416_s10, 4  ;;  %s1310_s17 = int_to_ptr.vmem [resolvable:$false] %s1309_s17 }
 0x5c1   : > { %p1307_p9 = pnand %p1306_p0, %p1548_p13  ;;  %s1311_s7 = scalar_lea.vmem %s1310_s17, 256 }
 0x5c2   : > { %p1312_p3 = scmp.lt.s32.totalorder %s1659_s28, %s1310_s17  ;;  %p1313_p5 = scmp.lt.s32.totalorder %s1311_s7, %s1305_s8 }
 0x5c3   : > { %p1308_p11 = pneg %p1307_p9 }
 0x5c4   : > { %p1314_p4 = por %p1313_p5, %p1312_p3 }
 0x5c6   : > { %p1315_p6 = pnand %p1314_p4, %p1308_p11 }
 0x5c8   : > { %1318 = shalt.err (!%p1315_p6)
}
 0x5c9   : > { %s1319_s16 = scalar_lea.hbm %s1657_s24, 128  ;;  %s1323_s13 = scalar_lea.hbm %s1734_s6, 256 }
 0x5ca   : > { %p1320_p2 = scmp.ne.s32.totalorder %s1657_s24, %s1319_s16  ;;  %p1324_p12 = scmp.lt.s32.totalorder %s1657_s24, %s1734_s6 }
 0x5cb   : > { %p1325_p7 = scmp.lt.s32.totalorder %s1323_s13, %s1319_s16 }
 0x5cc   : > { %p1321_p1 = pnand %p1320_p2, %p1548_p13 }
 0x5cd   : > { %p1326_p10 = por %p1325_p7, %p1324_p12 }
 0x5ce   : > { %p1322_p8 = pneg %p1321_p1 }
 0x5d0   : > { %p1327_p0 = pnand %p1326_p10, %p1322_p8 }
 0x5d2   : > { %1330 = shalt.err (!%p1327_p0)
}
 0x5d3   : > { %1040 = dma.vmem_to_hbm [thread:$0]  (%p1548_p13), %s1659_s28, 128, %s1657_s24, %s746_s0   ;;  %v690_v23 = vpop.f32.mrf.mxu1  ;;  %v736_v24 = vpop.f32.mrf.mxu0 }
 0x5d5   : > { %v1016_v25 = vpop.f32.mrf.mxu1  ;;  %v1022_v26 = vpop.f32.mrf.mxu0 }
 0x5d6 PF: > { %s786_s11 = sand.u32 1, %s1381_s21   ;;  %p1759_p9 = scmp.ne.s32.totalorder %s1743_s30, 0 }
 0x5d7   : > { %p1760_p11 = scmp.ge.s32.totalorder %s1401_s26, 2  ;;  %s787_s20 = scalar_lea.sflag [#allocation8], %s786_s11 }
 0x5d9   : > { %p1061_p3 = pnand %p1760_p11, %p1759_p9 }
 0x5db   : > { %p1062_p5 = pneg %p1061_p3 }
 0x5dd   : > { %1372 = dma.done.wait (%p1062_p5), %s787_s20, 128  }
 0x5de   : > { %1374 = vsyncadd (%p1062_p5), %s787_s20, 4294967168  ;;  %s796_s12 = scalar_lea.sflag [#allocation17], %s786_s11 }
 0x5df   : > { %1376 = dma.done.wait (%p1062_p5), %s796_s12, 128  }
 0x5e0   : > { %1378 = vsyncadd (%p1062_p5), %s796_s12, 4294967168  ;;  %s30_s26 = sadd.s32 1, %s1401_s26   ;;  %s1761_s21 = smov %s1385_s22 }
 0x5e1   : > { %p27_p13 = scmp.ge.s32.totalorder %s30_s26, 4   ;;  %s1762_s22 = smov %s1389_s23 }
 0x5e2   : > { %s1763_s23 = smov %s1560_s19  ;;  %s1764_s24 = smov %s1397_s25 }
 0x5e3   : > { %s1765_s25 = smov %s1767_s15  ;;  %29 = sbr.rel (!%p27_p13) target bundleno = 16 (0x10), region = 132 }
 0x5e8   :  { %801 = vsyncpa [#allocation7], 1 }
 0x5e9   :  { %803 = vsyncpa [#allocation7 + $0x1], 1 }
 0x5ea   :  { %804 = vsyncpa [#allocation10], 1 }
 0x5eb   :  { %806 = vsyncpa [#allocation10 + $0x1], 1 }
 0x5ec   :  { %807 = vsyncpa [#allocation13], 1 }
 0x5ed   :  { %808 = vsyncpa [#allocation8], 1 }
 0x5ee   :  { %810 = vsyncpa [#allocation8 + $0x1], 1 }
 0x5ef   :  { %811 = vsyncpa [#allocation17], 1 }
 0x5f0   :  { %813 = vsyncpa [#allocation17 + $0x1], 1 }

</bundles_post_ra>
